<compile_context>
chip_gen: v7x
topology: tpu7x:2x2x1
jax: 0.10.0
libtpu: 0.0.40
codegen_flags: <defaults>
</compile_context>

<pallas_src>
import functools

import jax
import jax.numpy as jnp
import numpy as np
from jax.experimental import pallas as pl
from jax.experimental.pallas import tpu as pltpu


# ----------------------------- Pallas kernels -------------------------------

def _sn_linear_kernel(inv_sigma_ref, x_ref, wt_ref, b_ref, o_ref, acc_ref):
    """acc (+)= x_tile @ wT_tile; at the last K step: out = acc * (1/sigma) + bias."""
    k = pl.program_id(2)
    partial = jnp.dot(x_ref[...], wt_ref[...], preferred_element_type=jnp.float32)

    @pl.when(k == 0)
    def _():
        acc_ref[...] = partial            # direct write: no zero-fill + reload

    @pl.when(k > 0)
    def _():
        acc_ref[...] += partial

    @pl.when(k == pl.num_programs(2) - 1)
    def _():
        o_ref[...] = (acc_ref[...] * inv_sigma_ref[0] + b_ref[...]).astype(o_ref.dtype)


def _sn_linear_kernel_single_k(inv_sigma_ref, x_ref, wt_ref, b_ref, o_ref):
    """Single-K-step fast path: no accumulator scratch round-trip."""
    y = jnp.dot(x_ref[...], wt_ref[...], preferred_element_type=jnp.float32)
    o_ref[...] = (y * inv_sigma_ref[0] + b_ref[...]).astype(o_ref.dtype)


# ------------------------------ helpers --------------------------------------

def _round_up(x, m):
    return ((x + m - 1) // m) * m


def _largest_divisor_multiple(total, cap, unit=128):
    """Largest multiple of `unit` that divides `total` (a multiple of `unit`) and <= cap."""
    t = min(cap, total)
    t -= t % unit
    t = max(t, unit)
    while total % t != 0:
        t -= unit
    return t


def _tpu_info():
    """(num_tensorcores, vmem_capacity_bytes) with conservative fallbacks."""
    num_cores = 1
    vmem_cap = 64 * 2 ** 20          # conservative (v7x has 64 MiB per TC)
    try:
        info = pltpu.get_tpu_info()
        cap = getattr(info, "vmem_capacity_bytes", None)
        if isinstance(cap, int) and cap > 0:
            vmem_cap = cap
        for attr in ("num_cores", "core_count", "tensorcore_count", "num_tensorcores"):
            n = getattr(info, attr, None)
            if isinstance(n, int) and n > 0:
                num_cores = n
                break
    except Exception:
        pass
    return num_cores, vmem_cap


# --------------------------- kernel-side apply --------------------------------

def _apply(x, wt, bias, inv_sigma, *, K, N, Kp, Np, compute_dtype,
           block_m, block_n, block_k):
    orig_dtype = x.dtype
    x2 = x.reshape(-1, K)
    M = x2.shape[0]

    itemsize = np.dtype(compute_dtype).itemsize
    sub = {4: 8, 2: 16, 1: 32}.get(itemsize, 8)       # native sublane tile of compute dtype
    out_bytes = np.dtype(orig_dtype).itemsize

    # Lane-dense tiles that divide the padded extents exactly.
    tk = _largest_divisor_multiple(Kp, block_k)
    tn = _largest_divisor_multiple(Np, block_n)

    num_cores, vmem_cap = _tpu_info()
    # Only split M for megacore sharding (v7x, 2 TCs) when each half keeps a healthy
    # MXU tile; on single-TC chips the grid is a serial loop, so keep tm large.
    if num_cores >= 2 and M >= 2 * 256:
        tm = _round_up(-(-M // num_cores), sub)
    else:
        tm = _round_up(max(M, 1), sub)
    tm = max(sub, min(block_m, tm))

    def vmem_need(tm_, tn_, tk_):
        return (2 * (tm_ * tk_ + tk_ * tn_) * itemsize   # double-buffered x / W^T tiles
                + 2 * tn_ * 4                            # bias (f32), double-buffered
                + tm_ * tn_ * 4                          # f32 accumulator scratch
                + 2 * tm_ * tn_ * out_bytes)             # double-buffered output tile

    budget = int(vmem_cap * 0.75)                        # leave headroom
    while vmem_need(tm, tn, tk) > budget and tk > 128:
        tk = _largest_divisor_multiple(Kp, tk - 128)
    while vmem_need(tm, tn, tk) > budget and tn > 128:
        tn = _largest_divisor_multiple(Np, tn - 128)
    while vmem_need(tm, tn, tk) > budget and tm > sub:
        tm = max(sub, tm // 2)

    Mp = _round_up(M, tm)

    # Skip the activation pad/copy (a full HBM round-trip) when shapes already align.
    if (Mp == M) and (Kp == K) and (x2.dtype == np.dtype(compute_dtype)):
        xp = x2
    else:
        xp = jnp.zeros((Mp, Kp), compute_dtype).at[:M, :K].set(x2.astype(compute_dtype))

    grid = (Mp // tm, Np // tn, Kp // tk)
    single_k = grid[2] == 1

    vmem_limit = int(min(max(vmem_need(tm, tn, tk) * 5 // 4, 16 * 2 ** 20), budget))

    kernel = _sn_linear_kernel_single_k if single_k else _sn_linear_kernel
    scratch = [] if single_k else [pltpu.VMEM((tm, tn), jnp.float32)]

    out = pl.pallas_call(
        kernel,
        out_shape=jax.ShapeDtypeStruct((Mp, Np), orig_dtype),
        grid_spec=pltpu.PrefetchScalarGridSpec(
            num_scalar_prefetch=0,
            grid=grid,
            in_specs=[
                pl.BlockSpec(memory_space=pltpu.MemorySpace.SMEM),   # inv_sigma (1,) scalar
                pl.BlockSpec((tm, tk), lambda i, j, k: (i, k)),      # x tile
                pl.BlockSpec((tk, tn), lambda i, j, k: (k, j)),      # W^T tile
                pl.BlockSpec((1, tn), lambda i, j, k: (0, j)),       # bias tile
            ],
            out_specs=pl.BlockSpec((tm, tn), lambda i, j, k: (i, j)),
            scratch_shapes=scratch,
        ),
        compiler_params=pltpu.CompilerParams(
            dimension_semantics=("parallel", "parallel", "arbitrary"),
            vmem_limit_bytes=vmem_limit),
    )(inv_sigma, xp, wt, bias)

    return out[:M, :N].reshape(*x.shape[:-1], N)


# --------------------- parameter preparation (hoisted, once) ------------------

def make_spectral_norm_linear(w, b, u, v, *, compute_dtype=None,
                              block_m=512, block_n=512, block_k=512):
    """Build a jitted forward(x) with all weight preprocessing done once.

    w: (N, K)  b: (N,)  u: (N,)  v: (K,)
    """
    N, K = w.shape
    cdt = np.dtype(w.dtype if compute_dtype is None else compute_dtype)

    # Eval-mode spectral norm: sigma = u^T W v using the frozen buffers.
    # TODO(synk): training-mode power iteration mutates the (u, v) buffers in place;
    #             that stateful update is not part of this inference kernel.
    sigma = jnp.dot(u.astype(jnp.float32),
                    jnp.dot(w.astype(jnp.float32), v.astype(jnp.float32)))
    inv_sigma = (1.0 / sigma).reshape(1).astype(jnp.float32)

    Kp = _round_up(K, 128)     # aligned vreg loads / clean MXU cadence (zero rows are free)
    Np = _round_up(N, 128)     # lane-dense output -> full-width unmasked vst
    wt = jnp.zeros((Kp, Np), cdt).at[:K, :N].set(w.T.astype(cdt))
    bias = jnp.zeros((1, Np), jnp.float32).at[0, :N].set(b.astype(jnp.float32))

    apply = functools.partial(_apply, K=K, N=N, Kp=Kp, Np=Np, compute_dtype=cdt,
                              block_m=block_m, block_n=block_n, block_k=block_k)
    return jax.jit(lambda x: apply(x, wt, bias, inv_sigma))


def spectral_norm_linear(x, w, b, u, v, **kwargs):
    """One-shot convenience wrapper (prefer make_spectral_norm_linear for reuse)."""
    return make_spectral_norm_linear(w, b, u, v, **kwargs)(x)


# ------------------------------ Pure-JAX reference ----------------------------

def reference_forward(x, w, b, u, v):
    sigma = jnp.dot(u, jnp.dot(w, v))
    return jnp.einsum("...k,nk->...n", x, w / sigma) + b


# ---------------------------------- main --------------------------------------

if __name__ == "__main__":
    key = jax.random.PRNGKey(0)
    kx, kw, kb, ku, kv = jax.random.split(key, 5)

    # Small shapes consistent with the module: batch=2, seq=8, in=32, out=24.
    B, S, IN_F, OUT_F = 2, 8, 32, 24
    x = jax.random.normal(kx, (B, S, IN_F), jnp.float32)
    w = 0.1 * jax.random.normal(kw, (OUT_F, IN_F), jnp.float32)
    b = 0.1 * jax.random.normal(kb, (OUT_F,), jnp.float32)

    # Spectral-norm buffers u, v: random unit vectors + a few power iterations
    # (setup only; mimics torch's buffers after some training steps).
    u = jax.random.normal(ku, (OUT_F,), jnp.float32)
    u = u / (jnp.linalg.norm(u) + 1e-12)
    v = jax.random.normal(kv, (IN_F,), jnp.float32)
    v = v / (jnp.linalg.norm(v) + 1e-12)
    for _ in range(5):
        v = w.T @ u
        v = v / (jnp.linalg.norm(v) + 1e-12)
        u = w @ v
        u = u / (jnp.linalg.norm(u) + 1e-12)

    ref = jax.block_until_ready(reference_forward(x, w, b, u, v))

    # f32 path — weight preprocessing hoisted (prepared once, applied per call).
    fwd = make_spectral_norm_linear(w, b, u, v)
    out = jax.block_until_ready(fwd(x))                                  # (2, 8, 24)
    np.testing.assert_allclose(np.asarray(out), np.asarray(ref), rtol=1e-3, atol=1e-3)

    # bf16-operand path (full-rate MXU; f32 accumulate + f32 epilogue).  Tolerance is
    # looser because torch scales W by 1/sigma in f32 before the matmul while here
    # operands are rounded to bf16 first — fine for inference.
    fwd_bf16 = make_spectral_norm_linear(w, b, u, v, compute_dtype=jnp.bfloat16)
    out_bf16 = jax.block_until_ready(fwd_bf16(x))
    np.testing.assert_allclose(np.asarray(out_bf16), np.asarray(ref),
                               rtol=2e-2, atol=2e-2)

    print("KERNEL_OK")
</pallas_src>

<mosaic_0001>
module attributes {stable_mosaic.version = 11 : i64} {
  func.func @_sn_linear_kernel_single_k(%arg0: i32, %arg1: i32, %arg2: i32, %arg3: memref<1xf32, #tpu.memory_space<smem>>, %arg4: memref<16x128xf32, #tpu.memory_space<vmem>>, %arg5: memref<128x128xf32, #tpu.memory_space<vmem>>, %arg6: memref<1x128xf32, #tpu.memory_space<vmem>>, %arg7: memref<16x128xf32, #tpu.memory_space<vmem>>) attributes {dimension_semantics = [#tpu.dimension_semantics<parallel>, #tpu.dimension_semantics<parallel>, #tpu.dimension_semantics<arbitrary>], iteration_bounds = array<i64: 1, 1, 1>, scalar_prefetch = 0 : i64, scratch_operands = 0 : i64, tpu.core_type = #tpu.core_type<tc>, window_params = [{transform_indices = @transform_0, window_bounds = array<i64: 1>}, {transform_indices = @transform_1, window_bounds = array<i64: 16, 128>}, {transform_indices = @transform_2, window_bounds = array<i64: 128, 128>}, {transform_indices = @transform_3, window_bounds = array<i64: 1, 128>}, {transform_indices = @transform_4, window_bounds = array<i64: 16, 128>}]} {
    %c0 = arith.constant 0 : index
    %c0_0 = arith.constant 0 : index
    %0 = vector.load %arg4[%c0, %c0_0] : memref<16x128xf32, #tpu.memory_space<vmem>>, vector<16x128xf32>
    %c0_1 = arith.constant 0 : index
    %c0_2 = arith.constant 0 : index
    %1 = vector.load %arg5[%c0_1, %c0_2] : memref<128x128xf32, #tpu.memory_space<vmem>>, vector<128x128xf32>
    %cst = arith.constant dense<0.000000e+00> : vector<16x128xf32>
    %2 = tpu.matmul %0, %1, %cst {dimension_numbers = #tpu.dot_dimension_numbers<[1], [0], [0], [1], [0, 0, 1, 1], [], []>} : vector<16x128xf32>, vector<128x128xf32>, vector<16x128xf32> -> vector<16x128xf32>
    %c0_3 = arith.constant 0 : index
    %3 = memref.load %arg3[%c0_3] : memref<1xf32, #tpu.memory_space<smem>>
    %4 = vector.broadcast %3 : f32 to vector<16x128xf32>
    %5 = arith.mulf %2, %4 : vector<16x128xf32>
    %c0_4 = arith.constant 0 : index
    %c0_5 = arith.constant 0 : index
    %6 = vector.load %arg6[%c0_4, %c0_5] : memref<1x128xf32, #tpu.memory_space<vmem>>, vector<1x128xf32>
    %7 = vector.broadcast %6 : vector<1x128xf32> to vector<16x128xf32>
    %8 = arith.addf %5, %7 : vector<16x128xf32>
    %c0_6 = arith.constant 0 : index
    %c0_7 = arith.constant 0 : index
    %9 = vector.load %arg7[%c0_6, %c0_7] : memref<16x128xf32, #tpu.memory_space<vmem>>, vector<16x128xf32>
    tpu.vector_store %arg7[%c0_6, %c0_7], %8 {strides = array<i32>} : memref<16x128xf32, #tpu.memory_space<vmem>>, vector<16x128xf32>,
    return
  }
  func.func @transform_0(%arg0: i32, %arg1: i32, %arg2: i32) -> i32 {
    %c0_i32 = arith.constant 0 : i32
    %c0_i32_0 = arith.constant 0 : i32
    return %c0_i32 : i32
  }
  func.func @transform_1(%arg0: i32, %arg1: i32, %arg2: i32) -> (i32, i32) {
    %c0_i32 = arith.constant 0 : i32
    return %arg0, %arg2 : i32, i32
  }
  func.func @transform_2(%arg0: i32, %arg1: i32, %arg2: i32) -> (i32, i32) {
    %c0_i32 = arith.constant 0 : i32
    return %arg2, %arg1 : i32, i32
  }
  func.func @transform_3(%arg0: i32, %arg1: i32, %arg2: i32) -> (i32, i32) {
    %c0_i32 = arith.constant 0 : i32
    %c0_i32_0 = arith.constant 0 : i32
    return %c0_i32, %arg1 : i32, i32
  }
  func.func @transform_4(%arg0: i32, %arg1: i32, %arg2: i32) -> (i32, i32) {
    %c0_i32 = arith.constant 0 : i32
    return %arg0, %arg1 : i32, i32
  }
}

</mosaic_0001>

<bundles_post_ra>
// kernel: _lambda_.1
= control target key start
LH: loop header
LB: loop body
LE: loop exit
PB: predicated region body
PF: predicated region fallthrough
CT: control target
= control target key end

     0   :  { %10 = vsyncpa [#allocation4], 0  ;;  %s258_s15 = smov [#allocation3]   ;;  %s316_s0 = inlined_call_operand.<no memory space> [shape: f32[1], index: 0, kind: input, shape index: {}]   ;;  %s317_s1 = inlined_call_operand.vmem [shape: f32[16,128], index: 1, kind: input, shape index: {}]   ;;  %s318_s2 = inlined_call_operand.hbm [shape: f32[128,128], index: 2, kind: input, shape index: {}]   ;;  %s319_s3 = inlined_call_operand.vmem [shape: f32[1,128], index: 3, kind: input, shape index: {}]   ;;  %s320_s4 = inlined_call_operand.vmem [shape: f32[16,128], index: 4, kind: output, shape index: {}]  }
   0x1   :  { %s20_s16 = sshll.u32 %s258_s15, 4  ;;  %s234_s19 = scalar_lea.hbm %s318_s2, 2048  ;;  %s21_s16 = int_to_ptr.vmem [resolvable:$true] %s20_s16 }
   0x2   :  { %p235_p0 = scmp.ne.s32.totalorder %s318_s2, %s234_s19  ;;  %p238_p1 = scmp.lt.u32.totalorder %s234_s19, %s318_s2 }
   0x4   :  { %p240_p2 = pnand %p238_p1, %p235_p0 }
   0x6   :  { %243 = shalt.err (!%p240_p2)
}
   0x7   :  { %s244_s24 = scalar_lea.vmem %s21_s16, 2048  ;;  %p249_p4 = scmp.lt.s32.totalorder %s21_s16, %s21_s16 }
   0x8   :  { %p245_p3 = scmp.ne.s32.totalorder %s21_s16, %s244_s24  ;;  %p250_p5 = scmp.lt.s32.totalorder %s244_s24, %s244_s24 }
   0xa   :  { %p251_p6 = por %p250_p5, %p249_p4 }
   0xc   :  { %p252_p7 = pnand %p251_p6, %p245_p3 }
   0xe   :  { %255 = shalt.err (!%p252_p7)
}
   0xf   :  { %s259_s25 = smov 128   ;;  %s260_s26 = smov 8  }
  0x10   :  { %26 = dma.hbm_to_vmem [thread:$0]  %s318_s2, 2048, %s21_s16, [#allocation4], %s259_s25, %s259_s25, %s260_s26  }
  0x11   :  { %256 = dma.done.wait [#allocation4], 2048  }
  0x12   :  { %257 = vsyncadd [#allocation4], 4294965248  ;;  %v34_v0 = vld [vmem:[#allocation3] sm:$0xff]  ;;  %v35_v1 = vld [vmem:[#allocation3 + $0x8] sm:$0xff]  ;;  %v126_v26 = vstv %s316_s0 }
  0x13   :  { %v36_v2 = vld [vmem:[#allocation3 + $0x10] sm:$0xff]  ;;  %v199_v3 = vpack.c.bf16 %v35_v1, %v34_v0  ;;  %v37_v4 = vld [vmem:[#allocation3 + $0x18] sm:$0xff]  ;;  %v38_v6 = vld [vmem:[#allocation3 + $0x20] sm:$0xff] }
  0x14   :  { %v203_v5 = vpack.c.bf16 %v37_v4, %v36_v2  ;;  %v39_v7 = vld [vmem:[#allocation3 + $0x28] sm:$0xff]  ;;  %v32_v9 = vld [vmem:[%s317_s1] sm:$0xff]  ;;  %v40_v10 = vld [vmem:[#allocation3 + $0x30] sm:$0xff] }
  0x15   :  { %200 = vmatprep.subr.bf16.mxu0 %v199_v3  ;;  %v207_v8 = vpack.c.bf16 %v39_v7, %v38_v6  ;;  %v41_v11 = vld [vmem:[#allocation3 + $0x38] sm:$0xff]  ;;  %196 = vmatprep.mubr.f32.mxu0 %v32_v9  ;;  %v42_v13 = vld [vmem:[#allocation3 + $0x40] sm:$0xff]  ;;  %v43_v14 = vld [vmem:[#allocation3 + $0x48] sm:$0xff] }
  0x16   :  { %202 = vmatpush3.bf16.msra.mxu0 %v199_v3  ;;  %v211_v12 = vpack.c.bf16 %v41_v11, %v40_v10  ;;  %v215_v15 = vpack.c.bf16 %v43_v14, %v42_v13  ;;  %v44_v16 = vld [vmem:[#allocation3 + $0x50] sm:$0xff]  ;;  %v45_v17 = vld [vmem:[#allocation3 + $0x58] sm:$0xff]  ;;  %v46_v19 = vld [vmem:[#allocation3 + $0x60] sm:$0xff] }
  0x17   :  { %204 = vmatprep.subr.bf16.mxu0 %v203_v5  ;;  %v219_v18 = vpack.c.bf16 %v45_v17, %v44_v16  ;;  %v47_v20 = vld [vmem:[#allocation3 + $0x68] sm:$0xff]  ;;  %v48_v22 = vld [vmem:[#allocation3 + $0x70] sm:$0xff]  ;;  %v49_v23 = vld [vmem:[#allocation3 + $0x78] sm:$0xff] }
  0x18   :  { %v223_v21 = vpack.c.bf16 %v47_v20, %v46_v19  ;;  %v227_v24 = vpack.c.bf16 %v49_v23, %v48_v22  ;;  %v33_v25 = vld [vmem:[%s317_s1 + $0x8] sm:$0xff]  ;;  %v145_v28 = vld [vmem:[%s319_s3] ss:$0 sm:$0xff] }
  0x1a   :  { %206 = vmatpush3.bf16.msra.mxu0 %v203_v5 }
  0x1b   :  { %208 = vmatprep.subr.bf16.mxu0 %v207_v8 }
  0x1e   :  { %210 = vmatpush3.bf16.msra.mxu0 %v207_v8 }
  0x1f   :  { %212 = vmatprep.subr.bf16.mxu0 %v211_v12 }
  0x22   :  { %214 = vmatpush3.bf16.msra.mxu0 %v211_v12 }
  0x23   :  { %216 = vmatprep.subr.bf16.mxu0 %v215_v15 }
  0x26   :  { %218 = vmatpush3.bf16.msra.mxu0 %v215_v15 }
  0x27   :  { %220 = vmatprep.subr.bf16.mxu0 %v219_v18 }
  0x2a   :  { %222 = vmatpush3.bf16.msra.mxu0 %v219_v18 }
  0x2b   :  { %224 = vmatprep.subr.bf16.mxu0 %v223_v21 }
  0x2e   :  { %226 = vmatpush3.bf16.msra.mxu0 %v223_v21 }
  0x2f   :  { %228 = vmatprep.subr.bf16.mxu0 %v227_v24 }
  0x32   :  { %230 = vmatpush3.bf16.msra.mxu0 %v227_v24 }
  0x35   :  { %197 = vmatmul.mubr.f32.vlgmr.msra.gmra.mrb[0].mxu0 %v33_v25 }
 0x108   :  { %v198_v27 = vpop.f32.mrb[0].mxu0 }
 0x109   :  { %v128_v29 = vmul.f32 %v198_v27, %v126_v26  ;;  %v116_v30 = vpop.f32.mrb[1].mxu0 }
 0x10a   :  { %v127_v31 = vmul.f32 %v126_v26, %v116_v30 }
 0x10b   :  { %v137_v32 = vadd.f32 %v145_v28, %v128_v29 }
 0x10c   :  { %v136_v33 = vadd.f32 %v145_v28, %v127_v31 }
 0x10d   :  { %139 = vst [vmem:[%s320_s4 + $0x8] sm:$0xff] %v137_v32 }
 0x10e   :  { %138 = vst [vmem:[%s320_s4] sm:$0xff] %v136_v33 }
 0x10f   :  { %144 = vsyncpa [#allocation4], 1 }

</bundles_post_ra>
